<compile_context>
chip_gen: v6e
topology: v6e:2x2x1
jax: 0.10.0
libtpu: 0.0.40
codegen_flags: <defaults>
</compile_context>

<pallas_src>
import math
from functools import partial

import jax
import jax.numpy as jnp
from jax.experimental import pallas as pl
from jax.experimental.pallas import tpu as pltpu


def _round_up(x, m):
    return (x + m - 1) // m * m


def _head_kernel(x_ref, w_ref, b_ref, o_ref):
    # o[c, m] = sum_k w[c, k] * x[m, k] + b[c]   (f32 accumulation on the MXU)
    acc = jax.lax.dot_general(
        w_ref[...], x_ref[...],
        dimension_numbers=(((1,), (1,)), ((), ())),   # contract d_encoder
        preferred_element_type=jnp.float32)
    o_ref[...] = (acc + b_ref[...]).astype(o_ref.dtype)


def _pick_tm(M, d_enc, in_itemsize, tm_max, vmem_budget_bytes=12 * 1024 * 1024):
    """Row-tile size: big enough for HBM roofline, >=2 grid steps when M allows,
    and double-buffered x tile comfortably under v5e's 16 MiB scoped VMEM."""
    tm = min(tm_max, _round_up(pl.cdiv(M, 2), 128))     # keep >= 2 grid steps
    cap = max(128, (vmem_budget_bytes // (2 * d_enc * in_itemsize)) // 128 * 128)
    return max(128, min(tm, cap))


def decoder_linear_forward(x, w, b, im_size, *, tm_max=2048,
                           compute_dtype=jnp.bfloat16):
    """DecoderLinear.forward.

    x: (B, N, d_encoder), w: (n_cls, d_encoder), b: (n_cls,)
    returns (B, n_cls, GS, GS) with GS = sqrt(N).
    """
    H, W = im_size                      # unused by the math; kept for fidelity
    B, N, d_enc = x.shape
    GS = math.isqrt(N)
    n_cls = w.shape[0]
    out_dtype = x.dtype

    # HBM-read-bound kernel: feed activations/weights in bf16 (MXU-native),
    # accumulate in f32.
    if compute_dtype is not None:
        x = x.astype(compute_dtype)
        w = w.astype(compute_dtype)

    M = B * N
    in_itemsize = jnp.dtype(x.dtype).itemsize
    out_itemsize = jnp.dtype(out_dtype).itemsize
    tm = _pick_tm(M, d_enc, in_itemsize, tm_max)
    n_blocks = pl.cdiv(M, tm)           # partial trailing block handled by Pallas

    xm = x.reshape(M, d_enc)
    b_col = b.reshape(n_cls, 1).astype(jnp.float32)

    cost = pl.CostEstimate(
        flops=2 * M * d_enc * n_cls,
        transcendentals=0,
        bytes_accessed=(M * d_enc * in_itemsize            # x read
                        + n_cls * d_enc * in_itemsize       # w read
                        + n_cls * 4                         # b read
                        + n_cls * M * out_itemsize))        # out write

    out_cm = pl.pallas_call(
        _head_kernel,
        out_shape=jax.ShapeDtypeStruct((n_cls, M), out_dtype),
        grid=(n_blocks,),
        in_specs=[
            pl.BlockSpec((tm, d_enc), lambda i: (i, 0)),     # activation rows
            pl.BlockSpec((n_cls, d_enc), lambda i: (0, 0)),  # weight, resident
            pl.BlockSpec((n_cls, 1), lambda i: (0, 0)),      # bias, resident
        ],
        out_specs=pl.BlockSpec((n_cls, tm), lambda i: (0, i)),  # lane-dense
        compiler_params=pltpu.CompilerParams(
            dimension_semantics=("parallel",)),
        cost_estimate=cost,
    )(xm, w, b_col)

    # 'c (b h w) -> b c h w'  (pure layout, done at the XLA boundary)
    out = out_cm.reshape(n_cls, B, GS, GS)
    return jnp.transpose(out, (1, 0, 2, 3))


if __name__ == "__main__":
    # Small config consistent with the module: ViT-Tiny-ish encoder width,
    # 16x16 patch grid, 2 classes.
    n_cls, patch_size, d_encoder = 2, 16, 192
    B, GS = 2, 16
    N = GS * GS
    im_size = (GS * patch_size, GS * patch_size)

    key = jax.random.PRNGKey(0)
    kx, kw, kb = jax.random.split(key, 3)
    x = jax.random.normal(kx, (B, N, d_encoder), dtype=jnp.float32)
    w = 0.02 * jax.random.normal(kw, (n_cls, d_encoder), dtype=jnp.float32)
    b = 0.02 * jax.random.normal(kb, (n_cls,), dtype=jnp.float32)

    fwd = jax.jit(partial(decoder_linear_forward, im_size=im_size))
    out = fwd(x, w, b)
    jax.block_until_ready(out)

    # pure-JAX f32 reference (same semantics as nn.Linear + rearrange)
    ref = jnp.einsum("bnd,cd->bnc", x, w,
                     precision=jax.lax.Precision.HIGHEST) + b
    ref = jnp.transpose(ref.reshape(B, GS, GS, n_cls), (0, 3, 1, 2))

    assert out.shape == (B, n_cls, GS, GS)
    # bf16 inputs + f32 accumulation vs f32 reference: errors ~1e-3 here.
    assert jnp.allclose(out, ref, rtol=2e-2, atol=2e-2), \
        float(jnp.max(jnp.abs(out - ref)))
    print("KERNEL_OK")
</pallas_src>

<mosaic_0001>
module attributes {stable_mosaic.version = 11 : i64} {
  func.func @_head_kernel(%arg0: i32, %arg1: memref<256x192xbf16, #tpu.memory_space<vmem>>, %arg2: memref<2x192xbf16, #tpu.memory_space<vmem>>, %arg3: memref<2x1xf32, #tpu.memory_space<vmem>>, %arg4: memref<2x256xf32, #tpu.memory_space<vmem>>) attributes {dimension_semantics = [#tpu.dimension_semantics<parallel>], iteration_bounds = array<i64: 2>, scalar_prefetch = 0 : i64, scratch_operands = 0 : i64, tpu.core_type = #tpu.core_type<tc>, window_params = [{transform_indices = @transform_0, window_bounds = array<i64: 256, 192>}, {pipeline_mode = #tpu.pipeline_mode<synchronous>, transform_indices = @transform_1, window_bounds = array<i64: 2, 192>}, {pipeline_mode = #tpu.pipeline_mode<synchronous>, transform_indices = @transform_2, window_bounds = array<i64: 2, 1>}, {transform_indices = @transform_3, window_bounds = array<i64: 2, 256>}]} {
    %c0 = arith.constant 0 : index
    %c0_0 = arith.constant 0 : index
    %0 = vector.load %arg2[%c0, %c0_0] : memref<2x192xbf16, #tpu.memory_space<vmem>>, vector<2x192xbf16>
    %c0_1 = arith.constant 0 : index
    %c0_2 = arith.constant 0 : index
    %1 = vector.load %arg1[%c0_1, %c0_2] : memref<256x192xbf16, #tpu.memory_space<vmem>>, vector<256x192xbf16>
    %cst = arith.constant dense<0.000000e+00> : vector<2x256xf32>
    %2 = tpu.matmul %0, %1, %cst {dimension_numbers = #tpu.dot_dimension_numbers<[1], [1], [0], [0], [0, 0, 1, 0], [], []>} : vector<2x192xbf16>, vector<256x192xbf16>, vector<2x256xf32> -> vector<2x256xf32>
    %c0_3 = arith.constant 0 : index
    %c0_4 = arith.constant 0 : index
    %3 = vector.load %arg3[%c0_3, %c0_4] : memref<2x1xf32, #tpu.memory_space<vmem>>, vector<2x1xf32>
    %4 = vector.broadcast %3 : vector<2x1xf32> to vector<2x256xf32>
    %5 = arith.addf %2, %4 : vector<2x256xf32>
    %c0_5 = arith.constant 0 : index
    %c0_6 = arith.constant 0 : index
    %6 = vector.load %arg4[%c0_5, %c0_6] : memref<2x256xf32, #tpu.memory_space<vmem>>, vector<2x256xf32>
    tpu.vector_store %arg4[%c0_5, %c0_6], %5 {strides = array<i32>} : memref<2x256xf32, #tpu.memory_space<vmem>>, vector<2x256xf32>,
    return
  }
  func.func @transform_0(%arg0: i32) -> (i32, i32) {
    %c0_i32 = arith.constant 0 : i32
    %c0_i32_0 = arith.constant 0 : i32
    return %arg0, %c0_i32 : i32, i32
  }
  func.func @transform_1(%arg0: i32) -> (i32, i32) {
    %c0_i32 = arith.constant 0 : i32
    %c0_i32_0 = arith.constant 0 : i32
    %c0_i32_1 = arith.constant 0 : i32
    return %c0_i32, %c0_i32_0 : i32, i32
  }
  func.func @transform_2(%arg0: i32) -> (i32, i32) {
    %c0_i32 = arith.constant 0 : i32
    %c0_i32_0 = arith.constant 0 : i32
    %c0_i32_1 = arith.constant 0 : i32
    return %c0_i32, %c0_i32_0 : i32, i32
  }
  func.func @transform_3(%arg0: i32) -> (i32, i32) {
    %c0_i32 = arith.constant 0 : i32
    %c0_i32_0 = arith.constant 0 : i32
    return %c0_i32, %arg0 : i32, i32
  }
}

</mosaic_0001>

<bundles_post_ra>
// kernel: decoder_linear_forward.1
= control target key start
LH: loop header
LB: loop body
LE: loop exit
PB: predicated region body
PF: predicated region fallthrough
CT: control target
= control target key end

     0   :  { %s698_s12 = smov 0   ;;  %s788_s0 = inlined_call_operand.vmem [shape: bf16[512,192], index: 0, kind: input, shape index: {}]   ;;  %s789_s1 = inlined_call_operand.vmem [shape: bf16[2,192], index: 1, kind: input, shape index: {}]   ;;  %s790_s2 = inlined_call_operand.vmem [shape: f32[2,1], index: 2, kind: input, shape index: {}]   ;;  %s791_s3 = inlined_call_operand.vmem [shape: f32[2,512], index: 3, kind: output, shape index: {}]  }
   0x1 LB: > { %s545_s13 = sadd.s32 4294967295, %s674_s12   ;;  %p549_p0 = scmp.ge.s32.totalorder %s674_s12, 1  ;;  %s674_s12 = sphi %s698_s12, %s13_s12  }
   0x2   : > { %p139_p1 = scmp.lt.s32.totalorder %s674_s12, 3 }
   0x4   : > { %p140_p2 = pnand %p549_p0, %p139_p1 }
   0x5   : > { %s550_s14 = sshll.u32 (!%p140_p2), %s545_s13, 5  ;;  %s553_s23 = sshll.u32 (!%p140_p2), %s545_s13, 1 }
   0x6   : > { %143 = sbr.rel (%p140_p2) target bundleno = 344 (0x158), region = 32  ;;  %p165_p3 = scmp.lt.s32.totalorder (!%p140_p2), %s550_s14, 63 }
   0x7   : > { %p172_p4 = scmp.lt.s32.totalorder (!%p140_p2), %s553_s23, 3 }
   0xb   : > { %v228_v0 = vlaneseq  ;;  %v676_v1 = vmov 1966171168   ;;  %v711_v3 = vld.sshfl [vmem:[%s789_s1] sm:$0x11 pattern:$0x75316420] }
   0xc   : > { %v226_v2 = vunpack.c.l.s4 %v676_v1  ;;  %s793_s14 = smov (!%p165_p3, %s550_s14), 63  ;;  %v224_v5 = vcombine.high %v711_v3, %v711_v3  ;;  %vm384_vm0 = vcmask 523264   ;;  %v677_v13 = vmov 0   ;;  %v210_v18 = vld [vmem:[%s790_s2] sm:$0x3]  ;;  %s795_s23 = smov (!%p172_p4, %s553_s23), 3 }
   0xd   : > { %v229_v4 = vshrl.u32 %v228_v0, 7  ;;  %s608_s17 = sshll.u32 %s793_s14, 3  ;;  %619 = vset.pattern.permute.xlu0 %v677_v13  ;;  %s554_s24 = sshll.u32 %s795_s23, 1 }
   0xe   : > { %v227_v6 = vunpack.c.0.s8 %v226_v2  ;;  %s720_s20 = scalar_lea.vmem %s788_s0, %s608_s17  ;;  %213 = vperm.xlu0 %619, %v210_v18   ;;  %s175_s27 = scalar_lea.vmem %s791_s3, %s554_s24 }
   0xf   : > { %v620_v8 = vld [vmem:[%s720_s20 + $0x74] ss:$8 sps:$4 sm:$0xff]   ;;  %v622_v11 = vld [vmem:[%s720_s20 + $0x70] ss:$8 sps:$4 sm:$0xff]   ;;  %v623_v12 = vld [vmem:[%s720_s20 + $0x64] ss:$8 sps:$4 sm:$0xff]  }
  0x10   : > { %v715_v7 = vsub.s32 %v227_v6, %v229_v4  ;;  %588 = vmatprep.subr.msk.bf16.mxu0 %vm384_vm0, %v620_v8  ;;  %v625_v14 = vld [vmem:[%s720_s20 + $0x60] ss:$8 sps:$4 sm:$0xff]   ;;  %v626_v15 = vld [vmem:[%s720_s20 + $0x54] ss:$8 sps:$4 sm:$0xff]   ;;  %v628_v16 = vld [vmem:[%s720_s20 + $0x50] ss:$8 sps:$4 sm:$0xff]  }
  0x11   : > { %437 = vmatpush1.bf16.xpose.msra.mxu0 %v622_v11  ;;  %v629_v17 = vld [vmem:[%s720_s20 + $0x44] ss:$8 sps:$4 sm:$0xff]   ;;  %v631_v19 = vld [vmem:[%s720_s20 + $0x40] ss:$8 sps:$4 sm:$0xff]   ;;  %v632_v20 = vld [vmem:[%s720_s20 + $0x34] ss:$8 sps:$4 sm:$0xff]  }
  0x12   : > { %v238_v9 = vrot.slane %v224_v5, %v715_v7  ;;  %v231_v10 = vrot.slane %v711_v3, %v715_v7  ;;  %589 = vmatprep.subr.msk.bf16.mxu0 %vm384_vm0, %v623_v12  ;;  %v634_v21 = vld [vmem:[%s720_s20 + $0x30] ss:$8 sps:$4 sm:$0xff]   ;;  %v635_v22 = vld [vmem:[%s720_s20 + $0x24] ss:$8 sps:$4 sm:$0xff]   ;;  %v637_v23 = vld [vmem:[%s720_s20 + $0x20] ss:$8 sps:$4 sm:$0xff]  }
  0x13   : > { %v638_v24 = vld [vmem:[%s720_s20 + $0x14] ss:$8 sps:$4 sm:$0xff]   ;;  %v640_v25 = vld [vmem:[%s720_s20 + $0x10] ss:$8 sps:$4 sm:$0xff]   ;;  %v641_v26 = vld [vmem:[%s720_s20 + $0x4] ss:$8 sps:$4 sm:$0xff]  }
  0x14   : > { %604 = vmatprep.mubr.msk.bf16.mxu0 %vm384_vm0, %v238_v9  ;;  %v643_v27 = vld [vmem:[%s720_s20] ss:$8 sps:$4 sm:$0xff]   ;;  %v644_v28 = vld [vmem:[%s720_s20 + $0xf4] ss:$8 sps:$4 sm:$0xff]   ;;  %v646_v29 = vld [vmem:[%s720_s20 + $0xf0] ss:$8 sps:$4 sm:$0xff]  }
  0x15   : > { %v647_v30 = vld [vmem:[%s720_s20 + $0xe4] ss:$8 sps:$4 sm:$0xff]   ;;  %v649_v31 = vld [vmem:[%s720_s20 + $0xe0] ss:$8 sps:$4 sm:$0xff]   ;;  %v650_v32 = vld [vmem:[%s720_s20 + $0xd4] ss:$8 sps:$4 sm:$0xff]  }
  0x16   : > { %v652_v33 = vld [vmem:[%s720_s20 + $0xd0] ss:$8 sps:$4 sm:$0xff]   ;;  %v653_v34 = vld [vmem:[%s720_s20 + $0xc4] ss:$8 sps:$4 sm:$0xff]   ;;  %v655_v35 = vld [vmem:[%s720_s20 + $0xc0] ss:$8 sps:$4 sm:$0xff]  }
  0x17   : > { %v656_v36 = vld [vmem:[%s720_s20 + $0xb4] ss:$8 sps:$4 sm:$0xff]   ;;  %v658_v37 = vld [vmem:[%s720_s20 + $0xb0] ss:$8 sps:$4 sm:$0xff]   ;;  %v659_v38 = vld [vmem:[%s720_s20 + $0xa4] ss:$8 sps:$4 sm:$0xff]  }
  0x18   : > { %v661_v39 = vld [vmem:[%s720_s20 + $0xa0] ss:$8 sps:$4 sm:$0xff]   ;;  %v662_v40 = vld [vmem:[%s720_s20 + $0x94] ss:$8 sps:$4 sm:$0xff]   ;;  %v664_v41 = vld [vmem:[%s720_s20 + $0x90] ss:$8 sps:$4 sm:$0xff]  }
  0x19   : > { %439 = vmatpush1.bf16.xpose.msra.mxu0 %v625_v14  ;;  %v665_v42 = vld [vmem:[%s720_s20 + $0x84] ss:$8 sps:$4 sm:$0xff]   ;;  %v667_v43 = vld [vmem:[%s720_s20 + $0x80] ss:$8 sps:$4 sm:$0xff]  }
  0x1a   : > { %590 = vmatprep.subr.msk.bf16.mxu0 %vm384_vm0, %v626_v15 }
  0x21   : > { %441 = vmatpush1.bf16.xpose.msra.mxu0 %v628_v16 }
  0x22   : > { %591 = vmatprep.subr.msk.bf16.mxu0 %vm384_vm0, %v629_v17 }
  0x29   : > { %443 = vmatpush1.bf16.xpose.msra.mxu0 %v631_v19 }
  0x2a   : > { %592 = vmatprep.subr.msk.bf16.mxu0 %vm384_vm0, %v632_v20 }
  0x31   : > { %445 = vmatpush1.bf16.xpose.msra.mxu0 %v634_v21 }
  0x32   : > { %593 = vmatprep.subr.msk.bf16.mxu0 %vm384_vm0, %v635_v22 }
  0x39   : > { %447 = vmatpush1.bf16.xpose.msra.mxu0 %v637_v23 }
  0x3a   : > { %594 = vmatprep.subr.msk.bf16.mxu0 %vm384_vm0, %v638_v24 }
  0x41   : > { %449 = vmatpush1.bf16.xpose.msra.mxu0 %v640_v25 }
  0x42   : > { %595 = vmatprep.subr.msk.bf16.mxu0 %vm384_vm0, %v641_v26 }
  0x49   : > { %451 = vmatpush1.bf16.xpose.msra.mxu0 %v643_v27 }
  0x4a   : > { %596 = vmatprep.subr.msk.bf16.mxu0 %vm384_vm0, %v644_v28 }
  0x51   : > { %453 = vmatpush2.bf16.xpose.msra.mxu0 %v646_v29 }
  0x52   : > { %597 = vmatprep.subr.msk.bf16.mxu0 %vm384_vm0, %v647_v30 }
  0x59   : > { %455 = vmatpush2.bf16.xpose.msra.mxu0 %v649_v31 }
  0x5a   : > { %598 = vmatprep.subr.msk.bf16.mxu0 %vm384_vm0, %v650_v32 }
  0x61   : > { %457 = vmatpush2.bf16.xpose.msra.mxu0 %v652_v33 }
  0x62   : > { %599 = vmatprep.subr.msk.bf16.mxu0 %vm384_vm0, %v653_v34 }
  0x69   : > { %459 = vmatpush2.bf16.xpose.msra.mxu0 %v655_v35 }
  0x6a   : > { %600 = vmatprep.subr.msk.bf16.mxu0 %vm384_vm0, %v656_v36 }
  0x71   : > { %461 = vmatpush2.bf16.xpose.msra.mxu0 %v658_v37 }
  0x72   : > { %601 = vmatprep.subr.msk.bf16.mxu0 %vm384_vm0, %v659_v38 }
  0x79   : > { %463 = vmatpush2.bf16.xpose.msra.mxu0 %v661_v39 }
  0x7a   : > { %602 = vmatprep.subr.msk.bf16.mxu0 %vm384_vm0, %v662_v40 }
  0x81   : > { %465 = vmatpush2.bf16.xpose.msra.mxu0 %v664_v41 }
  0x82   : > { %603 = vmatprep.subr.msk.bf16.mxu0 %vm384_vm0, %v665_v42 }
  0x89   : > { %467 = vmatpush2.bf16.xpose.msra.mxu0 %v667_v43  ;;  %v214_v44 = vpop.permute.xlu0 %213 }
  0x90   : > { %469 = vmatmul.mubr.bf16.vlgmr.msra.gmra.mxu0 %v231_v10 }
 0x150   : > { %v470_v45 = vpop.f32.mrf.mxu0 }
 0x151   : > { %v471_v47 = vadd.f32 %v470_v45, %v214_v44 }
 0x152   : > { %v472_v46 = vpop.f32.mrf.mxu0 }
 0x153   : > { %v473_v48 = vadd.f32 %v472_v46, %v214_v44 }
 0x154   : > { %v474_v49 = vpop.f32.mrf.mxu0 }
 0x155   : > { %v479_v50 = vcombine.low %v471_v47, %v473_v48 }
 0x156   : > { %v475_v51 = vpop.f32.mrf.mxu0 }
 0x157   : > { %605 = vst.sshfl [vmem:[%s175_s27] sm:$0x33 pattern:$0x76325410] %v479_v50 }
 0x158 PF: > { %s13_s12 = sadd.s32 1, %s674_s12  }
 0x159   : > { %p10_p5 = scmp.ge.s32.totalorder %s13_s12, 4  }
 0x15b   :  { %12 = sbr.rel (!%p10_p5) target bundleno = 1 (0x1), region = 62 }

</bundles_post_ra>
